<compile_context>
chip_gen: v7x
topology: tpu7x:2x2x1
jax: 0.10.0
libtpu: 0.0.40
codegen_flags: <defaults>
</compile_context>

<pallas_src>
import math
import functools

import jax
import jax.numpy as jnp
from jax.experimental import pallas as pl
from jax.experimental.pallas import tpu as pltpu


LANE = 128
_RESIDENT_W_MAX_BYTES = 8 * 1024 * 1024     # bf16 W that we allow to be VMEM-resident
_RESIDENT_N_MAX = 512                       # single lane-dense N tile on the fast path
_RESIDENT_VMEM_BUDGET = 24 * 1024 * 1024    # fits every generation's scoped VMEM


def _round_up(x, m):
    return ((x + m - 1) // m) * m


def _pick_tile(dim_pad, caps=(1024, 512, 256, 128)):
    """Largest cap that divides dim_pad exactly (dim_pad is a 128 multiple)."""
    for c in caps:
        if dim_pad % c == 0:
            return c
    return 128


def _tm_cap():
    """256 fills the 256x256 MXU on v6e/v7x; 128 on v5e (4x128x128 MXUs)."""
    try:
        kind = jax.devices()[0].device_kind.lower()
        if "v6" in kind or "v7" in kind:
            return 256
        return 128
    except Exception:  # pragma: no cover - conservative default
        return 128


# --------------------------------------------------------------------------
# Kernels
# --------------------------------------------------------------------------
def _linear_resident_kernel(x_ref, w_ref, b_ref, o_ref):
    """Resident-W path: K axis collapsed, W fetched once and kept in VMEM.

    x_ref: [tm, D_pad] f32    w_ref: [D_pad, N_out] bf16 (constant block)
    b_ref: [1, N_out]  f32    o_ref: [tm, N_out]  f32
    """
    # bf16 cast on the VPU hides under the MXU / DMA slack; X is read from HBM
    # exactly once in f32 (no external cast pass).
    x = x_ref[...].astype(jnp.bfloat16)
    o_ref[...] = (
        jnp.dot(x, w_ref[...], preferred_element_type=jnp.float32) + b_ref[...]
    ).astype(o_ref.dtype)


def _linear_tiled_kernel(x_ref, w_ref, b_ref, o_ref):
    """Tiled (M, N, K) fallback: accumulate directly into the resident o_ref.

    x_ref: [tm, tk] bf16   w_ref: [tk, tn] bf16   b_ref: [1, tn] f32
    o_ref: [tm, tn] f32 — block index (i, j) constant across k, so it stays
    VMEM-resident for the whole reduction (no scratch, no epilogue copy).
    """
    k = pl.program_id(2)

    @pl.when(k == 0)
    def _init():
        o_ref[...] = jnp.broadcast_to(b_ref[...], o_ref.shape)

    o_ref[...] += jnp.dot(
        x_ref[...], w_ref[...], preferred_element_type=jnp.float32
    )


# --------------------------------------------------------------------------
# Static tile / path selection (runs at trace time on Python ints)
# --------------------------------------------------------------------------
def choose_tiles(B, D_pad, N_out):
    """Returns (path, tm, tn, tk, B_pad, working_set_bytes)."""
    B16 = _round_up(max(B, 1), 16)          # bf16 vreg packs [16, 128] sublanes
    cap = _tm_cap()

    def pick_tm(c):
        tm = min(c, B16)
        if tm == B16 and B16 >= 32:
            # Split M once so a 'parallel' axis has extent >= 2 (v7x dual-TC).
            half = _round_up((B16 + 1) // 2, 16)
            if half < tm:
                tm = half
        return tm

    # ---- resident-W fast path (classifier-head regime) -------------------
    if N_out <= _RESIDENT_N_MAX and D_pad * N_out * 2 <= _RESIDENT_W_MAX_BYTES:
        for tm in (pick_tm(cap), 128, 64, 32, 16):
            ws = (2 * tm * D_pad * 4        # double-buffered f32 x tile
                  + 2 * D_pad * N_out * 2   # resident bf16 W (counted x2, safe)
                  + 2 * tm * N_out * 4      # double-buffered f32 out tile
                  + 2 * N_out * 4)          # bias
            if ws <= _RESIDENT_VMEM_BUDGET:
                return "resident", tm, N_out, D_pad, _round_up(B16, tm), ws

    # ---- tiled (M, N, K) fallback for very large D*N ---------------------
    tm = pick_tm(cap)
    tk = _pick_tile(D_pad)
    tn = _pick_tile(N_out, caps=(512, 256, 128))
    ws = (2 * tm * tk * 2 + 2 * tk * tn * 2 + 2 * tm * tn * 4 + 2 * tn * 4)
    return "tiled", tm, tn, tk, _round_up(B16, tm), ws


# --------------------------------------------------------------------------
# One-time parameter layout (outside the per-step forward)
# --------------------------------------------------------------------------
def prepare_linear_params(w, b, *, compute_dtype=jnp.bfloat16):
    """Pad + cast parameters ONCE.  w: [D, N] f32, b: [N] f32."""
    D, N = w.shape
    D_pad = _round_up(D, LANE)
    N_pad = _round_up(N, LANE)
    w_p = jnp.pad(w, ((0, D_pad - D), (0, N_pad - N))).astype(compute_dtype)
    b_p = jnp.pad(b, (0, N_pad - N)).astype(jnp.float32).reshape(1, N_pad)
    return w_p, b_p


# --------------------------------------------------------------------------
# Forward pass
# --------------------------------------------------------------------------
@functools.partial(
    jax.jit, static_argnames=("num_classes", "active_classes", "force_tiled")
)
def base_model_forward(x_nchw, w_p, b_p, *, num_classes, active_classes=None,
                       force_tiled=False):
    """Forward pass of the (instantiated) BaseModel.

    x_nchw: [B, C, H, W] f32 (PyTorch NCHW convention)
    w_p:    [D_pad, N_pad] bf16 (pre-padded weights), b_p: [1, N_pad] f32
    Returns logits [B, num_classes] (or [B, active_classes] for class-IL).
    """
    B, C, H, W = x_nchw.shape
    D = C * H * W
    D_pad, N_pad_full = w_p.shape

    # ---- static validation (all static under jit) -------------------------
    n_keep = num_classes if active_classes is None else active_classes
    if not (0 < n_keep <= num_classes):
        raise ValueError(f"active_classes={active_classes} out of range "
                         f"(num_classes={num_classes})")
    if num_classes > N_pad_full or D > D_pad:
        raise ValueError("parameters smaller than the model dimensions")

    # Only compute / write the columns we actually keep (class-IL).
    N_out = min(N_pad_full, _round_up(n_keep, LANE))
    w_used = w_p if N_out == N_pad_full else w_p[:, :N_out]
    b_used = b_p if N_out == N_pad_full else b_p[:, :N_out]

    path, tm, tn, tk, B_pad, ws = choose_tiles(B, D_pad, N_out)
    if force_tiled and path == "resident":
        path = "tiled"
        tk = _pick_tile(D_pad)
        tn = _pick_tile(N_out, caps=(512, 256, 128))
        ws = 2 * tm * tk * 2 + 2 * tk * tn * 2 + 2 * tm * tn * 4 + 2 * tn * 4

    vmem_limit = int(max(ws + (2 << 20), 16 << 20))

    # Flatten row-major (matches torch.flatten on NCHW contiguous tensors).
    x_flat = x_nchw.reshape(B, D)

    if path == "resident":
        # Keep X in f32; cast to bf16 inside the kernel (single HBM read of X).
        pad_b, pad_d = B_pad - B, D_pad - D
        if pad_b or pad_d:
            x_flat = jnp.pad(x_flat, ((0, pad_b), (0, pad_d)))

        cost = pl.CostEstimate(
            flops=2 * B_pad * D_pad * N_out,
            transcendentals=0,
            bytes_accessed=(B_pad * D_pad * 4 + D_pad * N_out * 2
                            + N_out * 4 + B_pad * N_out * 4),
        )
        logits_p = pl.pallas_call(
            _linear_resident_kernel,
            out_shape=jax.ShapeDtypeStruct((B_pad, N_out), jnp.float32),
            grid_spec=pltpu.PrefetchScalarGridSpec(
                num_scalar_prefetch=0,
                grid=(B_pad // tm,),
                in_specs=[
                    pl.BlockSpec((tm, D_pad), lambda i: (i, 0)),
                    # Constant block index: W is DMA'd once and stays resident.
                    pl.BlockSpec((D_pad, N_out), lambda i: (0, 0)),
                    pl.BlockSpec((1, N_out), lambda i: (0, 0)),
                ],
                out_specs=pl.BlockSpec((tm, N_out), lambda i: (i, 0)),
            ),
            compiler_params=pltpu.CompilerParams(
                dimension_semantics=("parallel",),
                vmem_limit_bytes=vmem_limit,
            ),
            cost_estimate=cost,
        )(x_flat, w_used, b_used)
    else:
        # Tiled (M, N, K): X is re-read across N tiles, so pre-cast to bf16.
        x_bf16 = x_flat.astype(jnp.bfloat16)
        pad_b, pad_d = B_pad - B, D_pad - D
        if pad_b or pad_d:
            x_bf16 = jnp.pad(x_bf16, ((0, pad_b), (0, pad_d)))

        n_tiles = N_out // tn
        cost = pl.CostEstimate(
            flops=2 * B_pad * D_pad * N_out,
            transcendentals=0,
            bytes_accessed=(B_pad * D_pad * 2 * n_tiles
                            + D_pad * N_out * 2 * (B_pad // tm)
                            + N_out * 4 + B_pad * N_out * 4),
        )
        logits_p = pl.pallas_call(
            _linear_tiled_kernel,
            out_shape=jax.ShapeDtypeStruct((B_pad, N_out), jnp.float32),
            grid_spec=pltpu.PrefetchScalarGridSpec(
                num_scalar_prefetch=0,
                grid=(B_pad // tm, N_out // tn, D_pad // tk),
                in_specs=[
                    pl.BlockSpec((tm, tk), lambda i, j, k: (i, k)),
                    pl.BlockSpec((tk, tn), lambda i, j, k: (k, j)),
                    pl.BlockSpec((1, tn), lambda i, j, k: (0, j)),
                ],
                out_specs=pl.BlockSpec((tm, tn), lambda i, j, k: (i, j)),
            ),
            compiler_params=pltpu.CompilerParams(
                dimension_semantics=("parallel", "parallel", "arbitrary"),
                vmem_limit_bytes=vmem_limit,
            ),
            cost_estimate=cost,
        )(x_bf16, w_used, b_used)

    # Strip padding; class-IL scenario slices to the active classes.
    return logits_p[:B, :n_keep]


# --------------------------------------------------------------------------
# Deterministic init matching nn.Linear's kaiming-uniform defaults
# --------------------------------------------------------------------------
def init_linear_params(key, in_features, out_features):
    k_w, k_b = jax.random.split(key)
    bound_w = math.sqrt(1.0 / in_features) * math.sqrt(3.0)
    w = jax.random.uniform(k_w, (in_features, out_features), jnp.float32,
                           minval=-bound_w, maxval=bound_w)
    bound_b = 1.0 / math.sqrt(in_features)
    b = jax.random.uniform(k_b, (out_features,), jnp.float32,
                           minval=-bound_b, maxval=bound_b)
    return w, b


if __name__ == "__main__":
    key = jax.random.PRNGKey(0)
    k_x, k_p, k_x2, k_p2 = jax.random.split(key, 4)

    # ------------------------------------------------------------------
    # 1) Resident-W fast path (default): NCHW [2, 4, 16, 16] -> 10 classes.
    # ------------------------------------------------------------------
    B, C, H, W = 2, 4, 16, 16
    num_classes = 10
    D = C * H * W

    x = jax.random.normal(k_x, (B, C, H, W), jnp.float32)
    w, b = init_linear_params(k_p, D, num_classes)
    w_p, b_p = prepare_linear_params(w, b)   # one-time layout, not per step

    logits = base_model_forward(x, w_p, b_p, num_classes=num_classes)
    logits = jax.block_until_ready(logits)

    # Class-incremental scenario: pred[:, :active_classes]
    # (classes_per_task=2, task 2 -> active_classes=6).
    logits_class = base_model_forward(x, w_p, b_p, num_classes=num_classes,
                                      active_classes=6)
    logits_class = jax.block_until_ready(logits_class)

    x_flat = x.reshape(B, D)
    ref_bf16 = jnp.dot(x_flat.astype(jnp.bfloat16), w.astype(jnp.bfloat16),
                       preferred_element_type=jnp.float32) + b
    ref_f32 = x_flat @ w + b

    assert logits.shape == (B, num_classes)
    assert logits_class.shape == (B, 6)
    assert jnp.allclose(logits, ref_bf16, atol=2e-3, rtol=2e-3)
    assert jnp.allclose(logits_class, ref_bf16[:, :6], atol=2e-3, rtol=2e-3)
    assert jnp.allclose(logits, ref_f32, atol=5e-2, rtol=5e-2)

    # test_epoch-style prediction: argmax over (active) classes.
    preds = jnp.argmax(logits, axis=1)
    _ = jax.block_until_ready(preds)

    # ------------------------------------------------------------------
    # 2) Tiled (M, N, K) fallback path, exercised with a multi-K-step shape.
    #    NCHW [2, 6, 16, 16] -> D = 1536 -> tk = 512 -> 3 reduction steps.
    # ------------------------------------------------------------------
    B2, C2, H2, W2 = 2, 6, 16, 16
    D2 = C2 * H2 * W2
    x2 = jax.random.normal(k_x2, (B2, C2, H2, W2), jnp.float32)
    w2, b2 = init_linear_params(k_p2, D2, num_classes)
    w2_p, b2_p = prepare_linear_params(w2, b2)

    logits2 = base_model_forward(x2, w2_p, b2_p, num_classes=num_classes,
                                 force_tiled=True)
    logits2 = jax.block_until_ready(logits2)

    x2_flat = x2.reshape(B2, D2)
    ref2_bf16 = jnp.dot(x2_flat.astype(jnp.bfloat16), w2.astype(jnp.bfloat16),
                        preferred_element_type=jnp.float32) + b2
    assert logits2.shape == (B2, num_classes)
    assert jnp.allclose(logits2, ref2_bf16, atol=2e-3, rtol=2e-3)

    print("KERNEL_OK")
</pallas_src>

<mosaic_0001>
module attributes {stable_mosaic.version = 11 : i64} {
  func.func @_linear_resident_kernel(%arg0: i32, %arg1: memref<16x1024xf32, #tpu.memory_space<vmem>>, %arg2: memref<1024x128xbf16, #tpu.memory_space<vmem>>, %arg3: memref<1x128xf32, #tpu.memory_space<vmem>>, %arg4: memref<16x128xf32, #tpu.memory_space<vmem>>) attributes {dimension_semantics = [#tpu.dimension_semantics<parallel>], iteration_bounds = array<i64: 1>, scalar_prefetch = 0 : i64, scratch_operands = 0 : i64, tpu.core_type = #tpu.core_type<tc>, window_params = [{transform_indices = @transform_0, window_bounds = array<i64: 16, 1024>}, {pipeline_mode = #tpu.pipeline_mode<synchronous>, transform_indices = @transform_1, window_bounds = array<i64: 1024, 128>}, {pipeline_mode = #tpu.pipeline_mode<synchronous>, transform_indices = @transform_2, window_bounds = array<i64: 1, 128>}, {transform_indices = @transform_3, window_bounds = array<i64: 16, 128>}]} {
    %c0 = arith.constant 0 : index
    %c0_0 = arith.constant 0 : index
    %0 = vector.load %arg1[%c0, %c0_0] : memref<16x1024xf32, #tpu.memory_space<vmem>>, vector<16x1024xf32>
    %1 = arith.truncf %0 : vector<16x1024xf32> to vector<16x1024xbf16>
    %c0_1 = arith.constant 0 : index
    %c0_2 = arith.constant 0 : index
    %2 = vector.load %arg2[%c0_1, %c0_2] : memref<1024x128xbf16, #tpu.memory_space<vmem>>, vector<1024x128xbf16>
    %cst = arith.constant dense<0.000000e+00> : vector<16x128xf32>
    %3 = tpu.matmul %1, %2, %cst {dimension_numbers = #tpu.dot_dimension_numbers<[1], [0], [0], [1], [0, 0, 1, 1], [], []>} : vector<16x1024xbf16>, vector<1024x128xbf16>, vector<16x128xf32> -> vector<16x128xf32>
    %c0_3 = arith.constant 0 : index
    %c0_4 = arith.constant 0 : index
    %4 = vector.load %arg3[%c0_3, %c0_4] : memref<1x128xf32, #tpu.memory_space<vmem>>, vector<1x128xf32>
    %5 = vector.broadcast %4 : vector<1x128xf32> to vector<16x128xf32>
    %6 = arith.addf %3, %5 : vector<16x128xf32>
    %c0_5 = arith.constant 0 : index
    %c0_6 = arith.constant 0 : index
    %7 = vector.load %arg4[%c0_5, %c0_6] : memref<16x128xf32, #tpu.memory_space<vmem>>, vector<16x128xf32>
    tpu.vector_store %arg4[%c0_5, %c0_6], %6 {strides = array<i32>} : memref<16x128xf32, #tpu.memory_space<vmem>>, vector<16x128xf32>,
    return
  }
  func.func @transform_0(%arg0: i32) -> (i32, i32) {
    %c0_i32 = arith.constant 0 : i32
    %c0_i32_0 = arith.constant 0 : i32
    return %arg0, %c0_i32 : i32, i32
  }
  func.func @transform_1(%arg0: i32) -> (i32, i32) {
    %c0_i32 = arith.constant 0 : i32
    %c0_i32_0 = arith.constant 0 : i32
    %c0_i32_1 = arith.constant 0 : i32
    return %c0_i32, %c0_i32_0 : i32, i32
  }
  func.func @transform_2(%arg0: i32) -> (i32, i32) {
    %c0_i32 = arith.constant 0 : i32
    %c0_i32_0 = arith.constant 0 : i32
    %c0_i32_1 = arith.constant 0 : i32
    return %c0_i32, %c0_i32_0 : i32, i32
  }
  func.func @transform_3(%arg0: i32) -> (i32, i32) {
    %c0_i32 = arith.constant 0 : i32
    %c0_i32_0 = arith.constant 0 : i32
    return %arg0, %c0_i32 : i32, i32
  }
}

</mosaic_0001>

<bundles_post_ra>
// kernel: base_model_forward.1
= control target key start
LH: loop header
LB: loop body
LE: loop exit
PB: predicated region body
PF: predicated region fallthrough
CT: control target
= control target key end

     0   :  { %8 = vsyncpa [#allocation3], 0  ;;  %s987_s12 = smov [#allocation2]   ;;  %s1079_s0 = inlined_call_operand.vmem [shape: f32[16,1024], index: 0, kind: input, shape index: {}]   ;;  %s1080_s1 = inlined_call_operand.hbm [shape: bf16[1024,128], index: 1, kind: input, shape index: {}]   ;;  %s1081_s2 = inlined_call_operand.vmem [shape: f32[1,128], index: 2, kind: input, shape index: {}]   ;;  %s1082_s3 = inlined_call_operand.vmem [shape: f32[16,128], index: 3, kind: output, shape index: {}]  }
   0x1   :  { %s16_s13 = sshll.u32 %s987_s12, 4  ;;  %s963_s16 = scalar_lea.hbm %s1080_s1, 8192  ;;  %s17_s13 = int_to_ptr.vmem [resolvable:$true] %s16_s13 }
   0x2   :  { %p964_p0 = scmp.ne.s32.totalorder %s1080_s1, %s963_s16  ;;  %p967_p1 = scmp.lt.u32.totalorder %s963_s16, %s1080_s1 }
   0x4   :  { %p969_p2 = pnand %p967_p1, %p964_p0 }
   0x6   :  { %972 = shalt.err (!%p969_p2)
}
   0x7   :  { %s973_s21 = scalar_lea.vmem %s17_s13, 8192  ;;  %p978_p4 = scmp.lt.s32.totalorder %s17_s13, %s17_s13 }
   0x8   :  { %p974_p3 = scmp.ne.s32.totalorder %s17_s13, %s973_s21  ;;  %p979_p5 = scmp.lt.s32.totalorder %s973_s21, %s973_s21 }
   0xa   :  { %p980_p6 = por %p979_p5, %p978_p4 }
   0xc   :  { %p981_p7 = pnand %p980_p6, %p974_p3 }
   0xe   :  { %984 = shalt.err (!%p981_p7)
}
   0xf   :  { %s988_s22 = smov 64   ;;  %s989_s23 = smov 4  }
  0x10   :  { %22 = dma.hbm_to_vmem [thread:$0]  %s1080_s1, 8192, %s17_s13, [#allocation3], %s988_s22, %s988_s22, %s989_s23  }
  0x11   :  { %985 = dma.done.wait [#allocation3], 8192  }
  0x12   :  { %986 = vsyncadd [#allocation3], 4294959104  ;;  %v899_v0 = vld [vmem:[#allocation2 + $0x40] sm:$0xff]   ;;  %v903_v4 = vld [vmem:[#allocation2 + $0x48] sm:$0xff]  }
  0x13   :  { %v900_v1 = vld [vmem:[#allocation2 + $0xc0] sm:$0xff]   ;;  %808 = vmatprep.subr.bf16.mxu0 %v899_v0  ;;  %v904_v5 = vld [vmem:[#allocation2 + $0xc8] sm:$0xff]   ;;  %v907_v8 = vld [vmem:[#allocation2 + $0x50] sm:$0xff]  }
  0x14   :  { %v901_v2 = vld [vmem:[#allocation2] sm:$0xff]   ;;  %830 = vmatprep.subr.bf16.mxu1 %v900_v1  ;;  %v905_v6 = vld [vmem:[#allocation2 + $0x8] sm:$0xff]   ;;  %v908_v9 = vld [vmem:[#allocation2 + $0xd0] sm:$0xff]  }
  0x15   :  { %v902_v3 = vld [vmem:[#allocation2 + $0x80] sm:$0xff]   ;;  %809 = vmatpush3.bf16.msra.mxu0 %v901_v2  ;;  %v906_v7 = vld [vmem:[#allocation2 + $0x88] sm:$0xff]   ;;  %v909_v10 = vld [vmem:[#allocation2 + $0x10] sm:$0xff]  }
  0x16   :  { %831 = vmatpush3.bf16.msra.mxu1 %v902_v3  ;;  %810 = vmatprep.subr.bf16.mxu0 %v903_v4  ;;  %v910_v11 = vld [vmem:[#allocation2 + $0x90] sm:$0xff]   ;;  %v911_v12 = vld [vmem:[#allocation2 + $0x58] sm:$0xff]   ;;  %v915_v16 = vld [vmem:[#allocation2 + $0x60] sm:$0xff]  }
  0x17   :  { %832 = vmatprep.subr.bf16.mxu1 %v904_v5  ;;  %v912_v13 = vld [vmem:[#allocation2 + $0xd8] sm:$0xff]   ;;  %v916_v17 = vld [vmem:[#allocation2 + $0xe0] sm:$0xff]   ;;  %v919_v20 = vld [vmem:[#allocation2 + $0x68] sm:$0xff]  }
  0x18   :  { %v913_v14 = vld [vmem:[#allocation2 + $0x18] sm:$0xff]   ;;  %v917_v18 = vld [vmem:[#allocation2 + $0x20] sm:$0xff]   ;;  %v920_v21 = vld [vmem:[#allocation2 + $0xe8] sm:$0xff]  }
  0x19   :  { %811 = vmatpush3.bf16.msra.mxu0 %v905_v6  ;;  %v914_v15 = vld [vmem:[#allocation2 + $0x98] sm:$0xff]   ;;  %v918_v19 = vld [vmem:[#allocation2 + $0xa0] sm:$0xff]   ;;  %v921_v22 = vld [vmem:[#allocation2 + $0x28] sm:$0xff]  }
  0x1a   :  { %833 = vmatpush3.bf16.msra.mxu1 %v906_v7  ;;  %812 = vmatprep.subr.bf16.mxu0 %v907_v8  ;;  %v922_v23 = vld [vmem:[#allocation2 + $0xa8] sm:$0xff]   ;;  %v923_v24 = vld [vmem:[#allocation2 + $0x70] sm:$0xff]   ;;  %v927_v28 = vld [vmem:[#allocation2 + $0x78] sm:$0xff]  }
  0x1b   :  { %834 = vmatprep.subr.bf16.mxu1 %v908_v9  ;;  %v924_v25 = vld [vmem:[#allocation2 + $0xf0] sm:$0xff]   ;;  %v928_v29 = vld [vmem:[#allocation2 + $0xf8] sm:$0xff]   ;;  %v30_v32 = vld [vmem:[%s1079_s0 + $0x8] sm:$0xff] }
  0x1c   :  { %v925_v26 = vld [vmem:[#allocation2 + $0x30] sm:$0xff]   ;;  %v929_v30 = vld [vmem:[#allocation2 + $0x38] sm:$0xff]   ;;  %v38_v33 = vld [vmem:[%s1079_s0 + $0x48] sm:$0xff] }
  0x1d   :  { %813 = vmatpush3.bf16.msra.mxu0 %v909_v10  ;;  %v926_v27 = vld [vmem:[#allocation2 + $0xb0] sm:$0xff]   ;;  %v930_v31 = vld [vmem:[#allocation2 + $0xb8] sm:$0xff]   ;;  %v46_v35 = vpack.c.bf16 %v38_v33, %v30_v32  ;;  %v29_v37 = vld [vmem:[%s1079_s0] sm:$0xff] }
  0x1e   :  { %835 = vmatpush3.bf16.msra.mxu1 %v910_v11  ;;  %814 = vmatprep.subr.bf16.mxu0 %v911_v12  ;;  %v32_v34 = vld [vmem:[%s1079_s0 + $0x18] sm:$0xff]  ;;  %v37_v38 = vld [vmem:[%s1079_s0 + $0x40] sm:$0xff]  ;;  %v31_v41 = vld [vmem:[%s1079_s0 + $0x10] sm:$0xff] }
  0x1f   :  { %836 = vmatprep.subr.bf16.mxu1 %v912_v13  ;;  %v40_v36 = vld [vmem:[%s1079_s0 + $0x58] sm:$0xff]  ;;  %v45_v40 = vpack.c.bf16 %v37_v38, %v29_v37  ;;  %v39_v42 = vld [vmem:[%s1079_s0 + $0x50] sm:$0xff]  ;;  %604 = vmatprep.mubr.bf16.mxu0 %v46_v35  ;;  %v931_v44 = vld [vmem:[#allocation2 + $0x140] sm:$0xff]  }
  0x20   :  { %v48_v39 = vpack.c.bf16 %v40_v36, %v32_v34  ;;  %v47_v43 = vpack.c.bf16 %v39_v42, %v31_v41  ;;  %v932_v45 = vld [vmem:[#allocation2 + $0x1c0] sm:$0xff]   ;;  %v935_v48 = vld [vmem:[#allocation2 + $0x148] sm:$0xff]   ;;  %v939_v52 = vld [vmem:[#allocation2 + $0x150] sm:$0xff]  }
  0x21   :  { %815 = vmatpush3.bf16.msra.mxu0 %v913_v14  ;;  %v933_v46 = vld [vmem:[#allocation2 + $0x100] sm:$0xff]   ;;  %v936_v49 = vld [vmem:[#allocation2 + $0x1c8] sm:$0xff]   ;;  %v940_v53 = vld [vmem:[#allocation2 + $0x1d0] sm:$0xff]  }
  0x22   :  { %837 = vmatpush3.bf16.msra.mxu1 %v914_v15  ;;  %816 = vmatprep.subr.bf16.mxu0 %v915_v16  ;;  %v934_v47 = vld [vmem:[#allocation2 + $0x180] sm:$0xff]   ;;  %v937_v50 = vld [vmem:[#allocation2 + $0x108] sm:$0xff]   ;;  %v941_v54 = vld [vmem:[#allocation2 + $0x110] sm:$0xff]  }
  0x23   :  { %838 = vmatprep.subr.bf16.mxu1 %v916_v17  ;;  %645 = vmatprep.mubr.bf16.mxu1 %v48_v39  ;;  %v938_v51 = vld [vmem:[#allocation2 + $0x188] sm:$0xff]   ;;  %v942_v55 = vld [vmem:[#allocation2 + $0x190] sm:$0xff]   ;;  %v943_v56 = vld [vmem:[#allocation2 + $0x158] sm:$0xff]  }
  0x24   :  { %v944_v57 = vld [vmem:[#allocation2 + $0x1d8] sm:$0xff]   ;;  %v947_v60 = vld [vmem:[#allocation2 + $0x160] sm:$0xff]   ;;  %v951_v0 = vld [vmem:[#allocation2 + $0x168] sm:$0xff]  }
  0x25   :  { %817 = vmatpush3.bf16.msra.mxu0 %v917_v18  ;;  %v945_v58 = vld [vmem:[#allocation2 + $0x118] sm:$0xff]   ;;  %v948_v61 = vld [vmem:[#allocation2 + $0x1e0] sm:$0xff]   ;;  %v952_v1 = vld [vmem:[#allocation2 + $0x1e8] sm:$0xff]  }
  0x26   :  { %839 = vmatpush3.bf16.msra.mxu1 %v918_v19  ;;  %818 = vmatprep.subr.bf16.mxu0 %v919_v20  ;;  %v946_v59 = vld [vmem:[#allocation2 + $0x198] sm:$0xff]   ;;  %v949_v62 = vld [vmem:[#allocation2 + $0x120] sm:$0xff]   ;;  %v953_v2 = vld [vmem:[#allocation2 + $0x128] sm:$0xff]  }
  0x27   :  { %840 = vmatprep.subr.bf16.mxu1 %v920_v21  ;;  %v950_v63 = vld [vmem:[#allocation2 + $0x1a0] sm:$0xff]   ;;  %v954_v3 = vld [vmem:[#allocation2 + $0x1a8] sm:$0xff]   ;;  %v955_v4 = vld [vmem:[#allocation2 + $0x170] sm:$0xff]  }
  0x28   :  { %v956_v5 = vld [vmem:[#allocation2 + $0x1f0] sm:$0xff]   ;;  %v959_v8 = vld [vmem:[#allocation2 + $0x178] sm:$0xff]   ;;  %v34_v12 = vld [vmem:[%s1079_s0 + $0x28] sm:$0xff] }
  0x29   :  { %819 = vmatpush3.bf16.msra.mxu0 %v921_v22  ;;  %v957_v6 = vld [vmem:[#allocation2 + $0x130] sm:$0xff]   ;;  %v960_v9 = vld [vmem:[#allocation2 + $0x1f8] sm:$0xff]   ;;  %v42_v13 = vld [vmem:[%s1079_s0 + $0x68] sm:$0xff] }
  0x2a   :  { %841 = vmatpush3.bf16.msra.mxu1 %v922_v23  ;;  %820 = vmatprep.subr.bf16.mxu0 %v923_v24  ;;  %v958_v7 = vld [vmem:[#allocation2 + $0x1b0] sm:$0xff]   ;;  %v961_v10 = vld [vmem:[#allocation2 + $0x138] sm:$0xff]   ;;  %v50_v16 = vpack.c.bf16 %v42_v13, %v34_v12  ;;  %v33_v18 = vld [vmem:[%s1079_s0 + $0x20] sm:$0xff] }
  0x2b   :  { %842 = vmatprep.subr.bf16.mxu1 %v924_v25  ;;  %v962_v11 = vld [vmem:[#allocation2 + $0x1b8] sm:$0xff]   ;;  %v41_v19 = vld [vmem:[%s1079_s0 + $0x60] sm:$0xff]  ;;  %v35_v20 = vld [vmem:[%s1079_s0 + $0x30] sm:$0xff] }
  0x2c   :  { %v36_v14 = vld [vmem:[%s1079_s0 + $0x38] sm:$0xff]  ;;  %v49_v21 = vpack.c.bf16 %v41_v19, %v33_v18  ;;  %v43_v22 = vld [vmem:[%s1079_s0 + $0x70] sm:$0xff] }
  0x2d   :  { %821 = vmatpush3.bf16.msra.mxu0 %v925_v26  ;;  %v44_v15 = vld [vmem:[%s1079_s0 + $0x78] sm:$0xff]  ;;  %v51_v23 = vpack.c.bf16 %v43_v22, %v35_v20  ;;  %v743_v26 = vld [vmem:[%s1081_s2] ss:$0 sm:$0xff] }
  0x2e   :  { %843 = vmatpush3.bf16.msra.mxu1 %v926_v27  ;;  %822 = vmatprep.subr.bf16.mxu0 %v927_v28  ;;  %v52_v17 = vpack.c.bf16 %v44_v15, %v36_v14 }
  0x2f   :  { %844 = vmatprep.subr.bf16.mxu1 %v928_v29 }
  0x31   :  { %823 = vmatpush3.bf16.msra.mxu0 %v929_v30 }
  0x32   :  { %845 = vmatpush3.bf16.msra.mxu1 %v930_v31  ;;  %852 = vmatprep.subr.bf16.mxu0 %v931_v44 }
  0x33   :  { %874 = vmatprep.subr.bf16.mxu1 %v932_v45 }
  0x34   :  { %605 = vmatmul.mubr.bf16.vlgmr.msra.gmra.mrb[0].mxu0 %v45_v40 }
  0x35   :  { %646 = vmatmul.mubr.bf16.vlgmr.msra.gmra.mrb[0].mxu1 %v47_v43  ;;  %853 = vmatpush3.bf16.msra.mxu0 %v933_v46 }
  0x36   :  { %875 = vmatpush3.bf16.msra.mxu1 %v934_v47  ;;  %854 = vmatprep.subr.bf16.mxu0 %v935_v48 }
  0x37   :  { %876 = vmatprep.subr.bf16.mxu1 %v936_v49  ;;  %686 = vmatprep.mubr.bf16.mxu0 %v50_v16 }
  0x38   :  { %727 = vmatprep.mubr.bf16.mxu1 %v52_v17 }
  0x39   :  { %855 = vmatpush3.bf16.msra.mxu0 %v937_v50 }
  0x3a   :  { %877 = vmatpush3.bf16.msra.mxu1 %v938_v51  ;;  %856 = vmatprep.subr.bf16.mxu0 %v939_v52 }
  0x3b   :  { %878 = vmatprep.subr.bf16.mxu1 %v940_v53 }
  0x3d   :  { %857 = vmatpush3.bf16.msra.mxu0 %v941_v54 }
  0x3e   :  { %879 = vmatpush3.bf16.msra.mxu1 %v942_v55  ;;  %858 = vmatprep.subr.bf16.mxu0 %v943_v56 }
  0x3f   :  { %880 = vmatprep.subr.bf16.mxu1 %v944_v57 }
  0x41   :  { %859 = vmatpush3.bf16.msra.mxu0 %v945_v58 }
  0x42   :  { %881 = vmatpush3.bf16.msra.mxu1 %v946_v59  ;;  %860 = vmatprep.subr.bf16.mxu0 %v947_v60 }
  0x43   :  { %882 = vmatprep.subr.bf16.mxu1 %v948_v61 }
  0x45   :  { %861 = vmatpush3.bf16.msra.mxu0 %v949_v62 }
  0x46   :  { %883 = vmatpush3.bf16.msra.mxu1 %v950_v63  ;;  %862 = vmatprep.subr.bf16.mxu0 %v951_v0 }
  0x47   :  { %884 = vmatprep.subr.bf16.mxu1 %v952_v1 }
  0x49   :  { %863 = vmatpush3.bf16.msra.mxu0 %v953_v2 }
  0x4a   :  { %885 = vmatpush3.bf16.msra.mxu1 %v954_v3  ;;  %864 = vmatprep.subr.bf16.mxu0 %v955_v4 }
  0x4b   :  { %886 = vmatprep.subr.bf16.mxu1 %v956_v5 }
  0x4d   :  { %865 = vmatpush3.bf16.msra.mxu0 %v957_v6 }
  0x4e   :  { %887 = vmatpush3.bf16.msra.mxu1 %v958_v7  ;;  %866 = vmatprep.subr.bf16.mxu0 %v959_v8 }
  0x4f   :  { %888 = vmatprep.subr.bf16.mxu1 %v960_v9 }
  0x51   :  { %867 = vmatpush3.bf16.msra.mxu0 %v961_v10 }
  0x52   :  { %889 = vmatpush3.bf16.msra.mxu1 %v962_v11 }
  0x54   :  { %687 = vmatmul.mubr.bf16.vlgmr.msra.gmra.mrb[4].mxu0 %v49_v21 }
  0x55   :  { %728 = vmatmul.mubr.bf16.vlgmr.msra.gmra.mrb[4].mxu1 %v51_v23 }
 0x107   :  { %v824_v24 = vpop.f32.mrb[0].mxu0 }
 0x108   :  { %v846_v25 = vpop.f32.mrb[0].mxu1  ;;  %v825_v27 = vpop.f32.mrb[1].mxu0 }
 0x109   :  { %v826_v28 = vadd.f32 %v825_v27, %v824_v24  ;;  %v847_v29 = vpop.f32.mrb[1].mxu1  ;;  %v827_v30 = vpop.f32.mrb[2].mxu0 }
 0x10a   :  { %v848_v31 = vadd.f32 %v847_v29, %v846_v25  ;;  %v849_v32 = vpop.f32.mrb[2].mxu1  ;;  %v828_v33 = vpop.f32.mrb[3].mxu0 }
 0x10b   :  { %v607_v34 = vadd.f32 %v826_v28, %v743_v26  ;;  %v829_v35 = vadd.f32 %v828_v33, %v827_v30  ;;  %v850_v36 = vpop.f32.mrb[3].mxu1 }
 0x10c   :  { %v851_v37 = vadd.f32 %v850_v36, %v849_v32 }
 0x10d   :  { %v648_v38 = vadd.f32 %v848_v31, %v607_v34  ;;  %v610_v39 = vadd.f32 %v829_v35, %v743_v26 }
 0x10f   :  { %v651_v40 = vadd.f32 %v851_v37, %v610_v39 }
 0x127   :  { %v868_v41 = vpop.f32.mrb[4].mxu0 }
 0x128   :  { %v890_v42 = vpop.f32.mrb[4].mxu1  ;;  %v869_v43 = vpop.f32.mrb[5].mxu0 }
 0x129   :  { %v870_v44 = vadd.f32 %v869_v43, %v868_v41  ;;  %v891_v45 = vpop.f32.mrb[5].mxu1  ;;  %v871_v46 = vpop.f32.mrb[6].mxu0 }
 0x12a   :  { %v892_v47 = vadd.f32 %v891_v45, %v890_v42  ;;  %v893_v48 = vpop.f32.mrb[6].mxu1  ;;  %v872_v49 = vpop.f32.mrb[7].mxu0 }
 0x12b   :  { %v689_v50 = vadd.f32 %v870_v44, %v648_v38  ;;  %v873_v51 = vadd.f32 %v872_v49, %v871_v46  ;;  %v894_v52 = vpop.f32.mrb[7].mxu1 }
 0x12c   :  { %v895_v53 = vadd.f32 %v894_v52, %v893_v48 }
 0x12d   :  { %v730_v54 = vadd.f32 %v892_v47, %v689_v50  ;;  %v692_v55 = vadd.f32 %v873_v51, %v651_v40 }
 0x12f   :  { %736 = vst [vmem:[%s1082_s3] sm:$0xff] %v730_v54  ;;  %v733_v56 = vadd.f32 %v895_v53, %v692_v55 }
 0x131   :  { %737 = vst [vmem:[%s1082_s3 + $0x8] sm:$0xff] %v733_v56 }
 0x132   :  { %742 = vsyncpa [#allocation3], 1 }

</bundles_post_ra>
